<compile_context>
chip_gen: v5e
topology: v5e:2x2
jax: 0.10.0
libtpu: 0.0.40
codegen_flags: <defaults>
</compile_context>

<pallas_src>
import functools

import jax
import jax.numpy as jnp
from jax.experimental import pallas as pl
from jax.experimental.pallas import tpu as pltpu


# ----------------------------- configuration ------------------------------ #
TARGET = 8        # self.target      (action space size per head)
NUM_HIDDENS = 32  # self.num_hiddens
BATCH = 8


# ------------------------------- kernel ----------------------------------- #
def baseline_kernel(obs_ref, col_ref, mat_ref, logits_ref, value_ref,
                    *, num_hiddens, num_actions):
    """Transposed (batch-on-lanes) forward pass.

    obs_ref    : (1, bB)           observations (row vector, batch on lanes)
    col_ref    : (64 + H + nh, 1)  [W1^T/target | b1^T | b2^T | bh^T]
    mat_ref    : (H + nh, W)       [W2^T (H,32) ; Wh^T (nh,H)]   (W = max(32,H))
    logits_ref : (2T, bB)
    value_ref  : (1, bB)
    """
    H = int(num_hiddens)
    T = int(num_actions)
    nh = 2 * T + 1  # fused head rows: [logits_a | logits_b | value]

    # Static slices of the packed slabs.  All start at lane 0 and on
    # 8-aligned sublanes -> free views, no realignment per grid step.
    w1t = col_ref[0:32, :]                      # (32, 1), already * 1/target
    b1t = col_ref[32:64, :]                     # (32, 1)
    b2t = col_ref[64:64 + H, :]                 # (H, 1)
    bht = col_ref[64 + H:64 + H + nh, :]        # (nh, 1)

    w2t = mat_ref[0:H, 0:32]                    # (H, 32)
    wht = mat_ref[H:H + nh, 0:H]                # (nh, H)

    x = obs_ref[...]                            # (1, bB)

    # Linear(1,32)+tanh: K=1, keep it a broadcasted VPU multiply
    # (w1t already carries the 1/target normalization).
    h1 = jnp.tanh(w1t * x + b1t)                # (32, bB)

    # Linear(32,H)+tanh: MXU dot with N = block_b on lanes.
    h2 = jnp.tanh(
        jnp.dot(w2t, h1, preferred_element_type=jnp.float32) + b2t
    )                                           # (H, bB)

    # Fused heads (logits_a | logits_b | value) in one MXU dot,
    # then two lane-dense stores.
    out = jnp.dot(wht, h2, preferred_element_type=jnp.float32) + bht  # (nh, bB)
    logits_ref[...] = out[0:2 * T, :]
    value_ref[...] = out[2 * T:nh, :]


# --------------------------- parameter packing ----------------------------- #
def pack_params(params, *, num_hiddens=NUM_HIDDENS, target=TARGET):
    """Pack the 11 tiny parameter tensors into 2 transposed, VMEM-friendly slabs."""
    H = num_hiddens
    T = target
    nh = 2 * T + 1
    W = max(32, H)

    # Column slab: all (X, 1) vectors stacked along sublanes.
    w1t = (params["w1"].T / float(target)).astype(jnp.float32)       # (32, 1)
    b1t = params["b1"].T.astype(jnp.float32)                         # (32, 1)
    b2t = params["b2"].T.astype(jnp.float32)                         # (H, 1)
    bht = jnp.concatenate(
        [params["ba"], params["bb"], params["bv"]], axis=-1
    ).T.astype(jnp.float32)                                          # (nh, 1)
    col = jnp.concatenate([w1t, b1t, b2t, bht], axis=0)              # (64+H+nh, 1)

    # Matrix slab: W2^T on top of Wh^T, each segment lane-0 aligned.
    w2t = jnp.zeros((H, W), jnp.float32).at[:, :32].set(
        params["w2"].T.astype(jnp.float32))                          # (H, W)
    wht = jnp.zeros((nh, W), jnp.float32).at[:, :H].set(
        jnp.concatenate([params["wa"], params["wb"], params["wv"]],
                        axis=-1).T.astype(jnp.float32))              # (nh, W)
    mat = jnp.concatenate([w2t, wht], axis=0)                        # (H+nh, W)
    return col, mat


# ------------------------------- wrapper ----------------------------------- #
def baseline_forward(obs, packed, *, target=TARGET, num_hiddens=NUM_HIDDENS,
                     block_b=None):
    """obs: (B, 1) float32. Returns (logits (B, 2*target), value (B, 1))."""
    col, mat = packed
    B = obs.shape[0]
    T = target

    # (B, 1) -> (1, B): free reshape of a contiguous array; batch goes to lanes.
    obs_t = obs.reshape(1, B)

    # Pick a batch block:
    #   * as large as possible (per-grid-step overhead ~0.35us dominates this
    #     tiny kernel), capped so everything fits default VMEM budgets;
    #   * but keep >= 2 grid steps when B allows, so "parallel" semantics can
    #     shard the batch across both v7x TensorCores;
    #   * multiples of 128 for lane-dense blocks.  Small / indivisible B falls
    #     back to a single full-array block.
    if block_b is None:
        block_b = B
        for cand in (16384, 8192, 4096, 2048, 1024, 512, 256, 128):
            if B % cand == 0 and B // cand >= 2:
                block_b = cand
                break
    assert B % block_b == 0
    grid = (B // block_b,)

    kernel = functools.partial(
        baseline_kernel, num_hiddens=num_hiddens, num_actions=target
    )

    logits_t, value_t = pl.pallas_call(
        kernel,
        out_shape=(
            jax.ShapeDtypeStruct((2 * T, B), jnp.float32),   # logits (lane-major)
            jax.ShapeDtypeStruct((1, B), jnp.float32),       # value  (lane-major)
        ),
        grid=grid,
        in_specs=[
            pl.BlockSpec((1, block_b), lambda i: (0, i)),    # obs tile (batch on lanes)
            pl.BlockSpec(col.shape, lambda i: (0, 0)),       # col slab (stays resident)
            pl.BlockSpec(mat.shape, lambda i: (0, 0)),       # mat slab (stays resident)
        ],
        out_specs=(
            pl.BlockSpec((2 * T, block_b), lambda i: (0, i)),
            pl.BlockSpec((1, block_b), lambda i: (0, i)),
        ),
        compiler_params=pltpu.CompilerParams(
            dimension_semantics=("parallel",),
            vmem_limit_bytes=32 * 1024 * 1024,
        ),
    )(obs_t, col, mat)

    # Restore the module's (B, 2T) / (B, 1) API:
    #   * value: (1, B) -> (B, 1) is a free, layout-preserving reshape;
    #   * logits: one tiny XLA transpose (the lane-dense kernel stores are the
    #     measured win; this re-orientation touches only 2T*B floats once).
    logits = logits_t.T
    value = value_t.reshape(B, 1)
    return logits, value


def value_function(value):
    # torch.reshape(self._value, [-1])
    return value.reshape(-1)


# --------------------------- parameter init -------------------------------- #
def init_params(key, *, num_hiddens=NUM_HIDDENS, target=TARGET):
    """Deterministic init mimicking torch.nn.Linear (U(-1/sqrt(fan_in), ...)).

    Weights stored as (in_features, out_features); biases as (1, out)."""
    def linear(k, fan_in, fan_out):
        kw, kb = jax.random.split(k)
        bound = 1.0 / (fan_in ** 0.5)
        w = jax.random.uniform(kw, (fan_in, fan_out), jnp.float32, -bound, bound)
        b = jax.random.uniform(kb, (1, fan_out), jnp.float32, -bound, bound)
        return w, b

    k1, k2, ka, kb, kv = jax.random.split(key, 5)
    w1, b1 = linear(k1, 1, 32)
    w2, b2 = linear(k2, 32, num_hiddens)
    wa, ba = linear(ka, num_hiddens, target)
    wb, bb = linear(kb, num_hiddens, target)
    wv, bv = linear(kv, num_hiddens, 1)
    return dict(w1=w1, b1=b1, w2=w2, b2=b2,
                wa=wa, ba=ba, wb=wb, bb=bb, wv=wv, bv=bv)


# --------------------------------- main ------------------------------------ #
if __name__ == "__main__":
    # TODO(synk): RLlib TorchModelV2 plumbing (config dict, state passthrough,
    # model summary printing) has no tensor-level equivalent; only the forward
    # math is implemented here.
    key = jax.random.PRNGKey(0)
    k_obs, k_params = jax.random.split(key)

    params = init_params(k_params)
    packed = pack_params(params)

    def reference(o):
        x = o / TARGET
        h = jnp.tanh(
            jnp.tanh(x @ params["w1"] + params["b1"]) @ params["w2"] + params["b2"]
        )
        ref_logits = jnp.concatenate(
            [h @ params["wa"] + params["ba"], h @ params["wb"] + params["bb"]],
            axis=-1,
        )
        ref_value = h @ params["wv"] + params["bv"]
        return ref_logits, ref_value

    # Small batch (single grid point), matches the module's typical use.
    obs = jax.random.uniform(k_obs, (BATCH, 1), jnp.float32, 0.0, float(TARGET))
    logits, value = baseline_forward(obs, packed, target=TARGET)
    logits, value = jax.block_until_ready((logits, value))
    ref_logits, ref_value = reference(obs)

    assert logits.shape == (BATCH, 2 * TARGET)
    assert value.shape == (BATCH, 1)
    assert value_function(value).shape == (BATCH,)
    assert jnp.allclose(logits, ref_logits, atol=1e-5, rtol=1e-5)
    assert jnp.allclose(value, ref_value, atol=1e-5, rtol=1e-5)

    # Larger batch: lane-dense blocks, >= 2 grid steps (block_b = 512) so the
    # "parallel" axis can shard across v7x's two TensorCores.
    obs_big = jax.random.uniform(
        jax.random.PRNGKey(1), (1024, 1), jnp.float32, 0.0, float(TARGET)
    )
    logits_big, value_big = baseline_forward(obs_big, packed, target=TARGET)
    logits_big, value_big = jax.block_until_ready((logits_big, value_big))
    ref_lb, ref_vb = reference(obs_big)
    assert logits_big.shape == (1024, 2 * TARGET)
    assert value_big.shape == (1024, 1)
    assert jnp.allclose(logits_big, ref_lb, atol=1e-5, rtol=1e-5)
    assert jnp.allclose(value_big, ref_vb, atol=1e-5, rtol=1e-5)

    print("KERNEL_OK")
</pallas_src>

<mosaic_0001>
module attributes {stable_mosaic.version = 11 : i64} {
  func.func @baseline_kernel(%arg0: i32, %arg1: memref<1x8xf32, #tpu.memory_space<vmem>>, %arg2: memref<113x1xf32, #tpu.memory_space<vmem>>, %arg3: memref<49x32xf32, #tpu.memory_space<vmem>>, %arg4: memref<16x8xf32, #tpu.memory_space<vmem>>, %arg5: memref<1x8xf32, #tpu.memory_space<vmem>>) attributes {dimension_semantics = [#tpu.dimension_semantics<parallel>], iteration_bounds = array<i64: 1>, scalar_prefetch = 0 : i64, scratch_operands = 0 : i64, tpu.core_type = #tpu.core_type<tc>, window_params = [{transform_indices = @transform_0, window_bounds = array<i64: 1, 8>}, {pipeline_mode = #tpu.pipeline_mode<synchronous>, transform_indices = @transform_1, window_bounds = array<i64: 113, 1>}, {pipeline_mode = #tpu.pipeline_mode<synchronous>, transform_indices = @transform_2, window_bounds = array<i64: 49, 32>}, {transform_indices = @transform_3, window_bounds = array<i64: 16, 8>}, {transform_indices = @transform_4, window_bounds = array<i64: 1, 8>}]} {
    %c0 = arith.constant 0 : index
    %c0_0 = arith.constant 0 : index
    %0 = vector.load %arg2[%c0, %c0_0] : memref<113x1xf32, #tpu.memory_space<vmem>>, vector<32x1xf32>
    %c32 = arith.constant 32 : index
    %c0_1 = arith.constant 0 : index
    %1 = vector.load %arg2[%c32, %c0_1] : memref<113x1xf32, #tpu.memory_space<vmem>>, vector<32x1xf32>
    %c64 = arith.constant 64 : index
    %c0_2 = arith.constant 0 : index
    %2 = vector.load %arg2[%c64, %c0_2] : memref<113x1xf32, #tpu.memory_space<vmem>>, vector<32x1xf32>
    %c96 = arith.constant 96 : index
    %c0_3 = arith.constant 0 : index
    %3 = vector.load %arg2[%c96, %c0_3] : memref<113x1xf32, #tpu.memory_space<vmem>>, vector<17x1xf32>
    %c0_4 = arith.constant 0 : index
    %c0_5 = arith.constant 0 : index
    %4 = vector.load %arg3[%c0_4, %c0_5] : memref<49x32xf32, #tpu.memory_space<vmem>>, vector<32x32xf32>
    %c32_6 = arith.constant 32 : index
    %c0_7 = arith.constant 0 : index
    %5 = vector.load %arg3[%c32_6, %c0_7] : memref<49x32xf32, #tpu.memory_space<vmem>>, vector<17x32xf32>
    %c0_8 = arith.constant 0 : index
    %c0_9 = arith.constant 0 : index
    %6 = vector.load %arg1[%c0_8, %c0_9] : memref<1x8xf32, #tpu.memory_space<vmem>>, vector<1x8xf32>
    %7 = vector.broadcast %0 : vector<32x1xf32> to vector<32x8xf32>
    %8 = vector.broadcast %6 : vector<1x8xf32> to vector<32x8xf32>
    %9 = arith.mulf %7, %8 : vector<32x8xf32>
    %10 = vector.broadcast %1 : vector<32x1xf32> to vector<32x8xf32>
    %11 = arith.addf %9, %10 : vector<32x8xf32>
    %12 = math.tanh %11 : vector<32x8xf32>
    %cst = arith.constant dense<0.000000e+00> : vector<32x8xf32>
    %13 = tpu.matmul %4, %12, %cst {dimension_numbers = #tpu.dot_dimension_numbers<[1], [0], [0], [1], [0, 0, 1, 1], [], []>} : vector<32x32xf32>, vector<32x8xf32>, vector<32x8xf32> -> vector<32x8xf32>
    %14 = vector.broadcast %2 : vector<32x1xf32> to vector<32x8xf32>
    %15 = arith.addf %13, %14 : vector<32x8xf32>
    %16 = math.tanh %15 : vector<32x8xf32>
    %cst_10 = arith.constant dense<0.000000e+00> : vector<17x8xf32>
    %17 = tpu.matmul %5, %16, %cst_10 {dimension_numbers = #tpu.dot_dimension_numbers<[1], [0], [0], [1], [0, 0, 1, 1], [], []>} : vector<17x32xf32>, vector<32x8xf32>, vector<17x8xf32> -> vector<17x8xf32>
    %18 = vector.broadcast %3 : vector<17x1xf32> to vector<17x8xf32>
    %19 = arith.addf %17, %18 : vector<17x8xf32>
    %20 = vector.extract_strided_slice %19 {offsets = [0, 0], sizes = [16, 8], strides = [1, 1]} : vector<17x8xf32> to vector<16x8xf32>
    %c0_11 = arith.constant 0 : index
    %c0_12 = arith.constant 0 : index
    %21 = vector.load %arg4[%c0_11, %c0_12] : memref<16x8xf32, #tpu.memory_space<vmem>>, vector<16x8xf32>
    tpu.vector_store %arg4[%c0_11, %c0_12], %20 {strides = array<i32>} : memref<16x8xf32, #tpu.memory_space<vmem>>, vector<16x8xf32>,
    %22 = vector.extract_strided_slice %19 {offsets = [16, 0], sizes = [1, 8], strides = [1, 1]} : vector<17x8xf32> to vector<1x8xf32>
    %c0_13 = arith.constant 0 : index
    %c0_14 = arith.constant 0 : index
    %23 = vector.load %arg5[%c0_13, %c0_14] : memref<1x8xf32, #tpu.memory_space<vmem>>, vector<1x8xf32>
    tpu.vector_store %arg5[%c0_13, %c0_14], %22 {strides = array<i32>} : memref<1x8xf32, #tpu.memory_space<vmem>>, vector<1x8xf32>,
    return
  }
  func.func @transform_0(%arg0: i32) -> (i32, i32) {
    %c0_i32 = arith.constant 0 : i32
    %c0_i32_0 = arith.constant 0 : i32
    return %c0_i32, %arg0 : i32, i32
  }
  func.func @transform_1(%arg0: i32) -> (i32, i32) {
    %c0_i32 = arith.constant 0 : i32
    %c0_i32_0 = arith.constant 0 : i32
    %c0_i32_1 = arith.constant 0 : i32
    return %c0_i32, %c0_i32_0 : i32, i32
  }
  func.func @transform_2(%arg0: i32) -> (i32, i32) {
    %c0_i32 = arith.constant 0 : i32
    %c0_i32_0 = arith.constant 0 : i32
    %c0_i32_1 = arith.constant 0 : i32
    return %c0_i32, %c0_i32_0 : i32, i32
  }
  func.func @transform_3(%arg0: i32) -> (i32, i32) {
    %c0_i32 = arith.constant 0 : i32
    %c0_i32_0 = arith.constant 0 : i32
    return %c0_i32, %arg0 : i32, i32
  }
  func.func @transform_4(%arg0: i32) -> (i32, i32) {
    %c0_i32 = arith.constant 0 : i32
    %c0_i32_0 = arith.constant 0 : i32
    return %c0_i32, %arg0 : i32, i32
  }
}

</mosaic_0001>

<bundles_post_ra>
// kernel: tpu_custom_call.1
= control target key start
LH: loop header
LB: loop body
LE: loop exit
PB: predicated region body
PF: predicated region fallthrough
CT: control target
= control target key end

     0   :  { %v299_v3 = vmov 0   ;;  %s411_s0 = inlined_call_operand.vmem [shape: f32[1,8], index: 0, kind: input, shape index: {}]   ;;  %s412_s1 = inlined_call_operand.vmem [shape: f32[113,1], index: 1, kind: input, shape index: {}]   ;;  %s413_s2 = inlined_call_operand.vmem [shape: f32[49,32], index: 2, kind: input, shape index: {}]   ;;  %s414_s3 = inlined_call_operand.vmem [shape: f32[16,8], index: 3, kind: output, shape index: {0}]   ;;  %s415_s4 = inlined_call_operand.hbm [shape: f32[1,8], index: 4, kind: output, shape index: {1}]  }
   0x1   :  { %v24_v0 = vld [vmem:[%s412_s1 + $0x38] sm:$0xff]  ;;  %v23_v1 = vld [vmem:[%s412_s1 + $0x30] sm:$0xff]  ;;  %255 = vset.pattern.permute.xlu2 %v299_v3  ;;  %254 = vset.pattern.permute.xlu1 %v299_v3 }
   0x2   :  { %v20_v2 = vld [vmem:[%s412_s1 + $0x18] sm:$0xff]  ;;  %253 = vset.pattern.permute.xlu0 %v299_v3  ;;  %84 = vperm.xlu1 %254, %v24_v0  }
   0x3   :  { %79 = vperm.xlu2 %255, %v23_v1   ;;  %57 = vperm.xlu0 %253, %v20_v2  }
   0x4   :  { %10 = vsyncpa [#allocation3], 0  ;;  %v18_v4 = vld [vmem:[%s412_s1 + $0x8] sm:$0xff]  ;;  %v19_v5 = vld [vmem:[%s412_s1 + $0x10] sm:$0xff]  ;;  %vm115_vm0 = vcmask 261120   ;;  %vm211_vm1 = vcmask 64512  }
   0x5   :  { %v17_v6 = vld [vmem:[%s412_s1] sm:$0xff]  ;;  %v22_v8 = vld [vmem:[%s412_s1 + $0x28] sm:$0xff]  ;;  %v28_v9 = vld [vmem:[%s412_s1 + $0x58] sm:$0xff]  ;;  %s300_s11 = smov [#allocation2]   ;;  %s225_s14 = sshll.u32 %s415_s4, 4  ;;  %vm214_vm2 = vcmask 57344   ;;  %s226_s14 = int_to_ptr.hbm [resolvable:$true] %s225_s14 }
   0x6   :  { %v21_v7 = vld [vmem:[%s412_s1 + $0x20] sm:$0xff]  ;;  %v26_v10 = vld [vmem:[%s412_s1 + $0x48] sm:$0xff]  ;;  %v27_v11 = vld [vmem:[%s412_s1 + $0x50] sm:$0xff]  ;;  %s223_s12 = sshll.u32 %s300_s11, 4  ;;  %s224_s12 = int_to_ptr.vmem [resolvable:$true] %s223_s12 }
   0x7   :  { %v25_v12 = vld [vmem:[%s412_s1 + $0x40] sm:$0xff]  ;;  %v31_v14 = vld [vmem:[%s412_s1 + $0x70] sm:$0x1]  ;;  %v30_v15 = vld [vmem:[%s412_s1 + $0x68] sm:$0xff] }
   0x8   :  { %v29_v13 = vld [vmem:[%s412_s1 + $0x60] sm:$0xff]  ;;  %v34_v37 = vld [vmem:[%s413_s2 + $0x10] sm:$0xff]  ;;  %v33_v39 = vld [vmem:[%s413_s2 + $0x8] sm:$0xff] }
   0x9   :  { %v256_v16 = vld [vmem:[%s411_s0] ss:$0 sm:$0xff]  ;;  %v35_v40 = vld [vmem:[%s413_s2 + $0x18] sm:$0xff]  ;;  %v37_v57 = vld [vmem:[%s413_s2 + $0x28] sm:$0xff] }
   0xa   :  { %47 = vperm.xlu1 %254, %v18_v4   ;;  %v32_v36 = vld [vmem:[%s413_s2] sm:$0xff]  ;;  %v38_v59 = vld [vmem:[%s413_s2 + $0x30] sm:$0x1] }
   0xb   :  { %52 = vperm.xlu0 %253, %v19_v5   ;;  %42 = vperm.xlu2 %255, %v17_v6   ;;  %v36_v56 = vld [vmem:[%s413_s2 + $0x20] sm:$0xff] }
  0x12   :  { %69 = vperm.xlu1 %254, %v21_v7  }
  0x13   :  { %74 = vperm.xlu0 %253, %v22_v8   ;;  %112 = vperm.xlu2 %255, %v28_v9  }
  0x1a   :  { %102 = vperm.xlu1 %254, %v26_v10  }
  0x1b   :  { %107 = vperm.xlu0 %253, %v27_v11   ;;  %97 = vperm.xlu2 %255, %v25_v12  }
  0x22   :  { %163 = vperm.xlu1 %254, %v29_v13  }
  0x23   :  { %173 = vperm.xlu0 %253, %v31_v14   ;;  %168 = vperm.xlu2 %255, %v30_v15  }
  0x5d   :  { %v80_v21 = vpop.permute.xlu2 %79 }
  0x65   :  { %v43_v27 = vpop.permute.xlu2 %42 }
  0x66   :  { %v63_v28 = vmul.f32 %v256_v16, %v43_v27 }
  0x6d   :  { %v113_v43 = vpop.permute.xlu2 %112 }
  0x74   :  { %v85_v17 = vpop.permute.xlu1 %84 }
  0x75   :  { %v58_v18 = vpop.permute.xlu0 %57  ;;  %v98_v51 = vpop.permute.xlu2 %97 }
  0x76   :  { %v66_v19 = vmul.f32 %v256_v16, %v58_v18 }
  0x78   :  { %v90_v20 = vadd.f32 %v85_v17, %v66_v19 }
  0x7a   :  { %257 = vtanh.f32 %v90_v20 }
  0x7c   :  { %v48_v22 = vpop.permute.xlu1 %47 }
  0x7d   :  { %v53_v23 = vpop.permute.xlu0 %52  ;;  %v64_v29 = vmul.f32 %v256_v16, %v48_v22  ;;  %v169_v63 = vpop.permute.xlu2 %168 }
  0x7e   :  { %v65_v24 = vmul.f32 %v256_v16, %v53_v23 }
  0x80   :  { %v258_v25 = vpop.eup %257  ;;  %v89_v26 = vadd.f32 %v80_v21, %v65_v24 }
  0x81   :  { %140 = vmatpush.msra.mxu0 %v258_v25  ;;  %243 = vmatpush.msra.mxu2 %v258_v25 }
  0x82   :  { %259 = vtanh.f32 %v89_v26 }
  0x84   :  { %v70_v30 = vpop.permute.xlu1 %69 }
  0x85   :  { %v75_v31 = vpop.permute.xlu0 %74  ;;  %v87_v33 = vadd.f32 %v70_v30, %v63_v28 }
  0x86   :  { %v88_v32 = vadd.f32 %v75_v31, %v64_v29 }
  0x88   :  { %v260_v34 = vpop.eup %259  ;;  %261 = vtanh.f32 %v88_v32 }
  0x89   :  { %141 = vmatpush.msra.mxu0 %v260_v34  ;;  %244 = vmatpush.msra.mxu2 %v260_v34  ;;  %263 = vtanh.f32 %v87_v33 }
  0x8c   :  { %v103_v49 = vpop.permute.xlu1 %102 }
  0x8d   :  { %v108_v44 = vpop.permute.xlu0 %107 }
  0x8e   :  { %v262_v35 = vpop.eup %261 }
  0x8f   :  { %142 = vmatpush.msra.mxu0 %v262_v35  ;;  %245 = vmatpush.msra.mxu2 %v262_v35  ;;  %v264_v38 = vpop.eup %263 }
  0x91   :  { %143 = vmatpush.msra.mxu0 %v264_v38  ;;  %246 = vmatpush.msra.mxu2 %v264_v38 }
  0x92   :  { %236 = vmatmul.msk.f32.vlgmr.msra.gmra.mxu0 %vm115_vm0, %v32_v36  ;;  %238 = vmatmul.msk.f32.vlgmr.msra.gmra.mxu2 %vm115_vm0, %v34_v37 }
  0x94   :  { %v164_v60 = vpop.permute.xlu1 %163 }
  0x95   :  { %v174_v2 = vpop.permute.xlu0 %173 }
  0x9a   :  { %237 = vmatmul.msk.f32.gmra.mxu0 %vm115_vm0, %v33_v39  ;;  %239 = vmatmul.msk.f32.gmra.mxu2 %vm115_vm0, %v35_v40 }
 0x10f   :  { %v145_v41 = vpop.f32.mrf.mxu0 }
 0x110   :  { %v146_v52 = vadd.f32 %v145_v41, %v98_v51 }
 0x115   :  { %v151_v42 = vpop.f32.mrf.mxu2 }
 0x116   :  { %v152_v47 = vadd.f32 %v151_v42, %v108_v44 }
 0x117   :  { %v148_v45 = vpop.f32.mrf.mxu0 }
 0x118   :  { %v149_v50 = vadd.f32 %v148_v45, %v103_v49 }
 0x11d   :  { %v154_v46 = vpop.f32.mrf.mxu2 }
 0x11e   :  { %v155_v48 = vadd.f32 %v154_v46, %v113_v43 }
 0x120   :  { %265 = vtanh.f32 %v155_v48 }
 0x121   :  { %267 = vtanh.f32 %v152_v47 }
 0x122   :  { %269 = vtanh.f32 %v149_v50 }
 0x123   :  { %271 = vtanh.f32 %v146_v52 }
 0x126   :  { %v266_v53 = vpop.eup %265 }
 0x127   :  { %197 = vmatpush.msra.mxu1 %v266_v53  ;;  %247 = vmatpush.msra.mxu3 %v266_v53  ;;  %v268_v54 = vpop.eup %267 }
 0x128   :  { %v270_v55 = vpop.eup %269 }
 0x129   :  { %198 = vmatpush.msra.mxu1 %v268_v54  ;;  %248 = vmatpush.msra.mxu3 %v268_v54  ;;  %v272_v58 = vpop.eup %271 }
 0x12b   :  { %199 = vmatpush.msra.mxu1 %v270_v55  ;;  %249 = vmatpush.msra.mxu3 %v270_v55 }
 0x12d   :  { %200 = vmatpush.msra.mxu1 %v272_v58  ;;  %250 = vmatpush.msra.mxu3 %v272_v58 }
 0x12e   :  { %240 = vmatmul.msk.f32.vlgmr.msra.gmra.mxu1 %vm115_vm0, %v36_v56  ;;  %241 = vmatmul.msk.f32.vlgmr.msra.gmra.mxu3 %vm115_vm0, %v37_v57 }
 0x136   :  { %242 = vmatmul.msk.f32.gmra.mxu3 %vm115_vm0, %v38_v59 }
 0x1ab   :  { %v202_v61 = vpop.f32.mrf.mxu1 }
 0x1ac   :  { %v203_v62 = vadd.f32 %v202_v61, %v164_v60 }
 0x1ae   :  { %212 = vst.msk [vmem:[%s414_s3] sm:$0xff] %vm211_vm1, %v203_v62 }
 0x1b1   :  { %v205_v0 = vpop.f32.mrf.mxu3 }
 0x1b2   :  { %v206_v1 = vadd.f32 %v205_v0, %v169_v63 }
 0x1b4   :  { %213 = vst.msk [vmem:[%s414_s3 + $0x8] sm:$0xff] %vm211_vm1, %v206_v1 }
 0x1b9   :  { %v208_v3 = vpop.f32.mrf.mxu3 }
 0x1ba   :  { %v209_v4 = vadd.f32 %v208_v3, %v174_v2 }
 0x1bc   :  { %215 = vst.msk [vmem:[#allocation2] sm:$0x1] %vm214_vm2, %v209_v4 }
 0x1bd   :  { %228 = dma.vmem_to_hbm [thread:$0]  %s224_s12, 16, %s226_s14, [#allocation3]  }
 0x1be   :  { %297 = dma.done.wait [#allocation3], 16  }
 0x1bf   :  { %298 = vsyncadd [#allocation3], 4294967280 }
 0x1c0   :  { %235 = vsyncpa [#allocation3], 1 }

</bundles_post_ra>
